<compile_context>
chip_gen: v7x
topology: tpu7x:2x2x1
jax: 0.10.0
libtpu: 0.0.40
codegen_flags: <defaults>
</compile_context>

<pallas_src>
import functools

import jax
import jax.numpy as jnp
from jax.experimental import pallas as pl
from jax.experimental.pallas import tpu as pltpu


def dqn_kernel(x_ref, w1_ref, b1_ref, wh_ref, bh_ref, w2_ref, b2_ref, out_ref,
               *, n2):
    # x is bf16, weights are bf16, biases are f32; accumulate in f32 on the MXU.
    x = x_ref[...]

    # feature = ReLU(Linear(input_dim, 128))
    feat = jnp.dot(x, w1_ref[...], preferred_element_type=jnp.float32) + b1_ref[...]
    feat = jnp.maximum(feat, 0.0).astype(jnp.bfloat16)

    # fused advantage/value hidden layers: one (128 -> 256) matmul + ReLU
    h = jnp.dot(feat, wh_ref[...], preferred_element_type=jnp.float32) + bh_ref[...]
    h = jnp.maximum(h, 0.0).astype(jnp.bfloat16)

    # fused block-diagonal output layer: one (256 -> 128-padded) matmul.
    # cols [0, out_dim) = advantages, col out_dim = value, rest = zero pad.
    y2 = jnp.dot(h, w2_ref[...], preferred_element_type=jnp.float32) + b2_ref[...]

    # write only the useful (out_dim + 1) columns (14x less HBM write traffic
    # than the 128-wide padded block).
    out_ref[...] = y2[:, :n2]


def dqn_forward(x, params, tb=1024):
    (w1, b1, wa1, ba1, wa2, ba2, wv1, bv1, wv2, bv2) = params
    B, input_dim = x.shape
    hidden = w1.shape[1]                      # 128
    out_dim = wa2.shape[1]
    n2 = out_dim + 1                          # adv columns + value column
    n2_pad = max(128, ((n2 + 127) // 128) * 128)   # lane-dense matmul width

    # ---- host-side branch fusion (no in-kernel concatenate) ----
    wh = jnp.concatenate([wa1, wv1], axis=1)            # (128, 256)
    bh = jnp.concatenate([ba1, bv1], axis=1)            # (1, 256)

    # block-diagonal fused output weight: (2*hidden, n2_pad)
    w2 = jnp.zeros((2 * hidden, n2_pad), jnp.float32)
    w2 = w2.at[:hidden, :out_dim].set(wa2)               # adv head
    w2 = w2.at[hidden:, out_dim:out_dim + 1].set(wv2)    # value head
    b2 = jnp.zeros((1, n2_pad), jnp.float32)
    b2 = b2.at[:, :out_dim].set(ba2)
    b2 = b2.at[:, out_dim:out_dim + 1].set(bv2)

    # ---- bf16 MXU operands (f32 accumulation stays inside the kernel) ----
    xb = x.astype(jnp.bfloat16)
    w1b = w1.astype(jnp.bfloat16)
    whb = wh.astype(jnp.bfloat16)
    w2b = w2.astype(jnp.bfloat16)

    # ---- batch tiling: multiple of 16 rows (bf16 sublane packing) ----
    tb = max(16, min(tb, ((B + 15) // 16) * 16))
    tb = ((tb + 15) // 16) * 16
    num_tiles = -(-B // tb)
    b_pad = num_tiles * tb
    if b_pad != B:
        xb = jnp.pad(xb, ((0, b_pad - B), (0, 0)))

    kernel = functools.partial(dqn_kernel, n2=n2)
    res_spec = lambda t: (0, 0)      # weights/biases: resident in VMEM

    y2 = pl.pallas_call(
        kernel,
        out_shape=jax.ShapeDtypeStruct((b_pad, n2), jnp.float32),
        grid=(num_tiles,),
        in_specs=[
            pl.BlockSpec((tb, input_dim), lambda t: (t, 0)),      # x (streamed)
            pl.BlockSpec((input_dim, hidden), res_spec),          # w1
            pl.BlockSpec((1, hidden), res_spec),                  # b1
            pl.BlockSpec((hidden, 2 * hidden), res_spec),         # wh (wa1|wv1)
            pl.BlockSpec((1, 2 * hidden), res_spec),              # bh
            pl.BlockSpec((2 * hidden, n2_pad), res_spec),         # w2 (block-diag)
            pl.BlockSpec((1, n2_pad), res_spec),                  # b2
        ],
        out_specs=pl.BlockSpec((tb, n2), lambda t: (t, 0)),
        compiler_params=pltpu.CompilerParams(
            dimension_semantics=("parallel",)),                   # independent tiles
    )(xb, w1b, b1, whb, bh, w2b, b2)

    # tiny XLA epilogue on the (B, out_dim+1) slice: global mean + combine.
    y2 = y2[:B]
    adv = y2[:, :out_dim]
    val = y2[:, out_dim:out_dim + 1]
    return val + (adv - jnp.mean(adv))


def init_params(key, input_dim, output_dim, hidden=128):
    """PyTorch-style uniform(-1/sqrt(fan_in), 1/sqrt(fan_in)) init, deterministic."""
    def linear(key, fan_in, fan_out):
        kw, kb = jax.random.split(key)
        bound = 1.0 / jnp.sqrt(float(fan_in))
        # stored as (in, out) so the kernel does x @ W
        w = jax.random.uniform(kw, (fan_in, fan_out), jnp.float32, -bound, bound)
        b = jax.random.uniform(kb, (1, fan_out), jnp.float32, -bound, bound)
        return w, b

    k1, k2, k3, k4, k5 = jax.random.split(key, 5)
    w1, b1 = linear(k1, input_dim, hidden)
    wa1, ba1 = linear(k2, hidden, hidden)
    wa2, ba2 = linear(k3, hidden, output_dim)
    wv1, bv1 = linear(k4, hidden, 1 * hidden)
    wv2, bv2 = linear(k5, hidden, 1)
    return (w1, b1, wa1, ba1, wa2, ba2, wv1, bv1, wv2, bv2)


def dqn_reference(x, params, matmul_dtype=jnp.float32):
    """Pure-JAX reference. matmul_dtype=bf16 mirrors the kernel's MXU casts."""
    (w1, b1, wa1, ba1, wa2, ba2, wv1, bv1, wv2, bv2) = params
    c = lambda a: a.astype(matmul_dtype)
    dot = lambda a, b: jnp.dot(c(a), c(b), preferred_element_type=jnp.float32)
    feat = jnp.maximum(dot(x, w1) + b1, 0.0)
    ha = jnp.maximum(dot(feat, wa1) + ba1, 0.0)
    hv = jnp.maximum(dot(feat, wv1) + bv1, 0.0)
    adv = dot(ha, wa2) + ba2
    val = dot(hv, wv2) + bv2
    return val + (adv - jnp.mean(adv))


if __name__ == "__main__":
    B, input_dim, output_dim = 2, 32, 8
    key = jax.random.PRNGKey(0)
    kx, kx2, kp = jax.random.split(key, 3)

    x = jax.random.normal(kx, (B, input_dim), dtype=jnp.float32)
    params = init_params(kp, input_dim, output_dim)

    out = jax.block_until_ready(dqn_forward(x, params))
    assert out.shape == (B, output_dim)
    # kernel uses bf16 matmul inputs -> compare against a bf16-matmul reference
    ref_bf16 = dqn_reference(x, params, matmul_dtype=jnp.bfloat16)
    assert jnp.allclose(out, ref_bf16, atol=2e-3, rtol=2e-3), "mismatch vs bf16 reference (B=2)"

    # exercise the multi-tile path (cross-tile global mean, padded batch rows)
    B2 = 40
    x2 = jax.random.normal(kx2, (B2, input_dim), dtype=jnp.float32)
    out2 = jax.block_until_ready(dqn_forward(x2, params, tb=16))
    ref2 = dqn_reference(x2, params, matmul_dtype=jnp.bfloat16)
    assert out2.shape == (B2, output_dim)
    assert jnp.allclose(out2, ref2, atol=2e-3, rtol=2e-3), "mismatch vs bf16 reference (tiled)"

    print("KERNEL_OK")
</pallas_src>

<mosaic_0001>
module attributes {stable_mosaic.version = 11 : i64} {
  func.func @dqn_kernel(%arg0: i32, %arg1: memref<16x32xbf16, #tpu.memory_space<vmem>>, %arg2: memref<32x128xbf16, #tpu.memory_space<vmem>>, %arg3: memref<1x128xf32, #tpu.memory_space<vmem>>, %arg4: memref<128x256xbf16, #tpu.memory_space<vmem>>, %arg5: memref<1x256xf32, #tpu.memory_space<vmem>>, %arg6: memref<256x128xbf16, #tpu.memory_space<vmem>>, %arg7: memref<1x128xf32, #tpu.memory_space<vmem>>, %arg8: memref<16x9xf32, #tpu.memory_space<vmem>>) attributes {dimension_semantics = [#tpu.dimension_semantics<parallel>], iteration_bounds = array<i64: 1>, scalar_prefetch = 0 : i64, scratch_operands = 0 : i64, tpu.core_type = #tpu.core_type<tc>, window_params = [{transform_indices = @transform_0, window_bounds = array<i64: 16, 32>}, {pipeline_mode = #tpu.pipeline_mode<synchronous>, transform_indices = @transform_1, window_bounds = array<i64: 32, 128>}, {pipeline_mode = #tpu.pipeline_mode<synchronous>, transform_indices = @transform_2, window_bounds = array<i64: 1, 128>}, {pipeline_mode = #tpu.pipeline_mode<synchronous>, transform_indices = @transform_3, window_bounds = array<i64: 128, 256>}, {pipeline_mode = #tpu.pipeline_mode<synchronous>, transform_indices = @transform_4, window_bounds = array<i64: 1, 256>}, {pipeline_mode = #tpu.pipeline_mode<synchronous>, transform_indices = @transform_5, window_bounds = array<i64: 256, 128>}, {pipeline_mode = #tpu.pipeline_mode<synchronous>, transform_indices = @transform_6, window_bounds = array<i64: 1, 128>}, {transform_indices = @transform_7, window_bounds = array<i64: 16, 9>}]} {
    %c0 = arith.constant 0 : index
    %c0_0 = arith.constant 0 : index
    %0 = vector.load %arg1[%c0, %c0_0] : memref<16x32xbf16, #tpu.memory_space<vmem>>, vector<16x32xbf16>
    %c0_1 = arith.constant 0 : index
    %c0_2 = arith.constant 0 : index
    %1 = vector.load %arg2[%c0_1, %c0_2] : memref<32x128xbf16, #tpu.memory_space<vmem>>, vector<32x128xbf16>
    %cst = arith.constant dense<0.000000e+00> : vector<16x128xf32>
    %2 = tpu.matmul %0, %1, %cst {dimension_numbers = #tpu.dot_dimension_numbers<[1], [0], [0], [1], [0, 0, 1, 1], [], []>} : vector<16x32xbf16>, vector<32x128xbf16>, vector<16x128xf32> -> vector<16x128xf32>
    %c0_3 = arith.constant 0 : index
    %c0_4 = arith.constant 0 : index
    %3 = vector.load %arg3[%c0_3, %c0_4] : memref<1x128xf32, #tpu.memory_space<vmem>>, vector<1x128xf32>
    %4 = vector.broadcast %3 : vector<1x128xf32> to vector<16x128xf32>
    %5 = arith.addf %2, %4 : vector<16x128xf32>
    %cst_5 = arith.constant 0.000000e+00 : f32
    %6 = vector.broadcast %cst_5 : f32 to vector<16x128xf32>
    %7 = arith.maximumf %5, %6 : vector<16x128xf32>
    %8 = arith.truncf %7 : vector<16x128xf32> to vector<16x128xbf16>
    %c0_6 = arith.constant 0 : index
    %c0_7 = arith.constant 0 : index
    %9 = vector.load %arg4[%c0_6, %c0_7] : memref<128x256xbf16, #tpu.memory_space<vmem>>, vector<128x256xbf16>
    %cst_8 = arith.constant dense<0.000000e+00> : vector<16x256xf32>
    %10 = tpu.matmul %8, %9, %cst_8 {dimension_numbers = #tpu.dot_dimension_numbers<[1], [0], [0], [1], [0, 0, 1, 1], [], []>} : vector<16x128xbf16>, vector<128x256xbf16>, vector<16x256xf32> -> vector<16x256xf32>
    %c0_9 = arith.constant 0 : index
    %c0_10 = arith.constant 0 : index
    %11 = vector.load %arg5[%c0_9, %c0_10] : memref<1x256xf32, #tpu.memory_space<vmem>>, vector<1x256xf32>
    %12 = vector.broadcast %11 : vector<1x256xf32> to vector<16x256xf32>
    %13 = arith.addf %10, %12 : vector<16x256xf32>
    %cst_11 = arith.constant 0.000000e+00 : f32
    %14 = vector.broadcast %cst_11 : f32 to vector<16x256xf32>
    %15 = arith.maximumf %13, %14 : vector<16x256xf32>
    %16 = arith.truncf %15 : vector<16x256xf32> to vector<16x256xbf16>
    %c0_12 = arith.constant 0 : index
    %c0_13 = arith.constant 0 : index
    %17 = vector.load %arg6[%c0_12, %c0_13] : memref<256x128xbf16, #tpu.memory_space<vmem>>, vector<256x128xbf16>
    %cst_14 = arith.constant dense<0.000000e+00> : vector<16x128xf32>
    %18 = tpu.matmul %16, %17, %cst_14 {dimension_numbers = #tpu.dot_dimension_numbers<[1], [0], [0], [1], [0, 0, 1, 1], [], []>} : vector<16x256xbf16>, vector<256x128xbf16>, vector<16x128xf32> -> vector<16x128xf32>
    %c0_15 = arith.constant 0 : index
    %c0_16 = arith.constant 0 : index
    %19 = vector.load %arg7[%c0_15, %c0_16] : memref<1x128xf32, #tpu.memory_space<vmem>>, vector<1x128xf32>
    %20 = vector.broadcast %19 : vector<1x128xf32> to vector<16x128xf32>
    %21 = arith.addf %18, %20 : vector<16x128xf32>
    %22 = vector.extract_strided_slice %21 {offsets = [0, 0], sizes = [16, 9], strides = [1, 1]} : vector<16x128xf32> to vector<16x9xf32>
    %c0_17 = arith.constant 0 : index
    %c0_18 = arith.constant 0 : index
    %23 = vector.load %arg8[%c0_17, %c0_18] : memref<16x9xf32, #tpu.memory_space<vmem>>, vector<16x9xf32>
    tpu.vector_store %arg8[%c0_17, %c0_18], %22 {strides = array<i32>} : memref<16x9xf32, #tpu.memory_space<vmem>>, vector<16x9xf32>,
    return
  }
  func.func @transform_0(%arg0: i32) -> (i32, i32) {
    %c0_i32 = arith.constant 0 : i32
    %c0_i32_0 = arith.constant 0 : i32
    return %arg0, %c0_i32 : i32, i32
  }
  func.func @transform_1(%arg0: i32) -> (i32, i32) {
    %c0_i32 = arith.constant 0 : i32
    %c0_i32_0 = arith.constant 0 : i32
    %c0_i32_1 = arith.constant 0 : i32
    return %c0_i32, %c0_i32_0 : i32, i32
  }
  func.func @transform_2(%arg0: i32) -> (i32, i32) {
    %c0_i32 = arith.constant 0 : i32
    %c0_i32_0 = arith.constant 0 : i32
    %c0_i32_1 = arith.constant 0 : i32
    return %c0_i32, %c0_i32_0 : i32, i32
  }
  func.func @transform_3(%arg0: i32) -> (i32, i32) {
    %c0_i32 = arith.constant 0 : i32
    %c0_i32_0 = arith.constant 0 : i32
    %c0_i32_1 = arith.constant 0 : i32
    return %c0_i32, %c0_i32_0 : i32, i32
  }
  func.func @transform_4(%arg0: i32) -> (i32, i32) {
    %c0_i32 = arith.constant 0 : i32
    %c0_i32_0 = arith.constant 0 : i32
    %c0_i32_1 = arith.constant 0 : i32
    return %c0_i32, %c0_i32_0 : i32, i32
  }
  func.func @transform_5(%arg0: i32) -> (i32, i32) {
    %c0_i32 = arith.constant 0 : i32
    %c0_i32_0 = arith.constant 0 : i32
    %c0_i32_1 = arith.constant 0 : i32
    return %c0_i32, %c0_i32_0 : i32, i32
  }
  func.func @transform_6(%arg0: i32) -> (i32, i32) {
    %c0_i32 = arith.constant 0 : i32
    %c0_i32_0 = arith.constant 0 : i32
    %c0_i32_1 = arith.constant 0 : i32
    return %c0_i32, %c0_i32_0 : i32, i32
  }
  func.func @transform_7(%arg0: i32) -> (i32, i32) {
    %c0_i32 = arith.constant 0 : i32
    %c0_i32_0 = arith.constant 0 : i32
    return %arg0, %c0_i32 : i32, i32
  }
}

</mosaic_0001>

<bundles_post_ra>
// kernel: tpu_custom_call.1
= control target key start
LH: loop header
LB: loop body
LE: loop exit
PB: predicated region body
PF: predicated region fallthrough
CT: control target
= control target key end

     0   :  { %12 = vsyncpa [#allocation3], 0  ;;  %s903_s0 = inlined_call_operand.hbm [shape: bf16[16,32], index: 0, kind: input, shape index: {}]   ;;  %s904_s1 = inlined_call_operand.hbm [shape: bf16[32,128], index: 1, kind: input, shape index: {}]   ;;  %s905_s2 = inlined_call_operand.vmem [shape: f32[1,128], index: 2, kind: input, shape index: {}]   ;;  %s906_s3 = inlined_call_operand.hbm [shape: bf16[128,256], index: 3, kind: input, shape index: {}]   ;;  %s907_s4 = inlined_call_operand.vmem [shape: f32[1,256], index: 4, kind: input, shape index: {}]   ;;  %s908_s5 = inlined_call_operand.hbm [shape: bf16[256,128], index: 5, kind: input, shape index: {}]   ;;  %s909_s6 = inlined_call_operand.vmem [shape: f32[1,128], index: 6, kind: input, shape index: {}]   ;;  %s910_s7 = inlined_call_operand.hbm [shape: f32[16,9], index: 7, kind: output, shape index: {}]  }
   0x1   :  { %13 = vsyncpa [#allocation6], 0 }
   0x2   :  { %14 = vsyncpa [#allocation9], 0 }
   0x3   :  { %15 = vsyncpa [#allocation4], 0  ;;  %s760_s24 = smov [#allocation5]   ;;  %s761_s26 = smov [#allocation2]  }
   0x4   :  { %s33_s25 = sshll.u32 %s760_s24, 4  ;;  %s21_s27 = sshll.u32 %s761_s26, 4  ;;  %s34_s25 = int_to_ptr.vmem [resolvable:$true] %s33_s25  ;;  %s812_s27 = int_to_ptr.vmem [resolvable:$true] %s21_s27 }
   0x5   :  { %s642_s30 = scalar_lea.hbm %s904_s1, 256 }
   0x6   :  { %p643_p0 = scmp.ne.s32.totalorder %s904_s1, %s642_s30  ;;  %p646_p1 = scmp.lt.u32.totalorder %s642_s30, %s904_s1 }
   0x8   :  { %p648_p2 = pnand %p646_p1, %p643_p0 }
   0xa   :  { %651 = shalt.err (!%p648_p2)
}
   0xb   :  { %s652_s12 = scalar_lea.vmem %s34_s25, 256  ;;  %p657_p4 = scmp.lt.s32.totalorder %s34_s25, %s34_s25 }
   0xc   :  { %p653_p3 = scmp.ne.s32.totalorder %s34_s25, %s652_s12  ;;  %p658_p5 = scmp.lt.s32.totalorder %s652_s12, %s652_s12 }
   0xe   :  { %p659_p6 = por %p658_p5, %p657_p4 }
  0x10   :  { %p660_p7 = pnand %p659_p6, %p653_p3 }
  0x12   :  { %663 = shalt.err (!%p660_p7)
}
  0x13   :  { %s762_s13 = smov 64   ;;  %s763_s14 = smov 4  }
  0x14   :  { %39 = dma.hbm_to_vmem [thread:$0]  %s904_s1, 256, %s34_s25, [#allocation6], %s762_s13, %s762_s13, %s763_s14  }
  0x15   :  { %s664_s19 = scalar_lea.hbm %s903_s0, 128 }
  0x16   :  { %p665_p8 = scmp.ne.s32.totalorder %s903_s0, %s664_s19  ;;  %p668_p9 = scmp.lt.u32.totalorder %s664_s19, %s903_s0 }
  0x18   :  { %p670_p10 = pnand %p668_p9, %p665_p8 }
  0x1a   :  { %673 = shalt.err (!%p670_p10)
}
  0x1b   :  { %s674_s24 = scalar_lea.vmem %s812_s27, 128  ;;  %p679_p12 = scmp.lt.s32.totalorder %s812_s27, %s812_s27 }
  0x1c   :  { %p675_p11 = scmp.ne.s32.totalorder %s812_s27, %s674_s24  ;;  %p680_p13 = scmp.lt.s32.totalorder %s674_s24, %s674_s24 }
  0x1e   :  { %p681_p0 = por %p680_p13, %p679_p12 }
  0x20   :  { %p682_p1 = pnand %p681_p0, %p675_p11 }
  0x22   :  { %685 = shalt.err (!%p682_p1)
}
  0x23   :  { %27 = dma.hbm_to_vmem [thread:$0]  %s903_s0, 128, %s812_s27, [#allocation3], %s762_s13, %s762_s13, %s763_s14  }
  0x24   :  { %s764_s26 = smov [#allocation7]   ;;  %s686_s8 = scalar_lea.hbm %s906_s3, 2048 }
  0x25   :  { %s47_s28 = sshll.u32 %s764_s26, 4  ;;  %p687_p2 = scmp.ne.s32.totalorder %s906_s3, %s686_s8  ;;  %s48_s28 = int_to_ptr.vmem [resolvable:$true] %s47_s28 }
  0x26   :  { %p690_p3 = scmp.lt.u32.totalorder %s686_s8, %s906_s3 }
  0x28   :  { %p692_p4 = pnand %p690_p3, %p687_p2 }
  0x2a   :  { %695 = shalt.err (!%p692_p4)
}
  0x2b   :  { %s696_s15 = scalar_lea.vmem %s48_s28, 2048  ;;  %p701_p6 = scmp.lt.s32.totalorder %s48_s28, %s48_s28 }
  0x2c   :  { %p697_p5 = scmp.ne.s32.totalorder %s48_s28, %s696_s15  ;;  %p702_p7 = scmp.lt.s32.totalorder %s696_s15, %s696_s15 }
  0x2e   :  { %p703_p8 = por %p702_p7, %p701_p6 }
  0x30   :  { %p704_p9 = pnand %p703_p8, %p697_p5 }
  0x32   :  { %707 = shalt.err (!%p704_p9)
}
  0x33   :  { %s765_s0 = smov 128   ;;  %s766_s27 = smov 8  }
  0x34   :  { %53 = dma.hbm_to_vmem [thread:$0]  %s906_s3, 2048, %s48_s28, [#allocation6], %s765_s0, %s765_s0, %s766_s27  }
  0x35   :  { %s767_s18 = smov [#allocation8]   ;;  %s708_s22 = scalar_lea.hbm %s908_s5, 2048 }
  0x36   :  { %s61_s19 = sshll.u32 %s767_s18, 4  ;;  %p709_p10 = scmp.ne.s32.totalorder %s908_s5, %s708_s22  ;;  %s62_s19 = int_to_ptr.vmem [resolvable:$true] %s61_s19 }
  0x37   :  { %p712_p11 = scmp.lt.u32.totalorder %s708_s22, %s908_s5 }
  0x39   :  { %p714_p12 = pnand %p712_p11, %p709_p10 }
  0x3b   :  { %717 = shalt.err (!%p714_p12)
}
  0x3c   :  { %s718_s26 = scalar_lea.vmem %s62_s19, 2048  ;;  %p723_p0 = scmp.lt.s32.totalorder %s62_s19, %s62_s19 }
  0x3d   :  { %p719_p13 = scmp.ne.s32.totalorder %s62_s19, %s718_s26  ;;  %p724_p1 = scmp.lt.s32.totalorder %s718_s26, %s718_s26 }
  0x3f   :  { %p725_p2 = por %p724_p1, %p723_p0 }
  0x41   :  { %p726_p3 = pnand %p725_p2, %p719_p13 }
  0x43   :  { %729 = shalt.err (!%p726_p3)
}
  0x44   :  { %67 = dma.hbm_to_vmem [thread:$0]  %s908_s5, 2048, %s62_s19, [#allocation9], %s762_s13, %s762_s13, %s763_s14  }
  0x45   :  { %752 = dma.done.wait [#allocation3], 128  }
  0x46   :  { %753 = vsyncadd [#allocation3], 4294967168 }
  0x47   :  { %754 = dma.done.wait [#allocation6], 2304  }
  0x48   :  { %755 = vsyncadd [#allocation6], 4294964992 }
  0x49   :  { %756 = dma.done.wait [#allocation9], 2048  }
  0x4a   :  { %757 = vsyncadd [#allocation9], 4294965248  ;;  %v768_v0 = vmov 0.0   ;;  %vm769_vm0 = vmmov 0   ;;  %v599_v1 = vld [vmem:[#allocation5] sm:$0xff]   ;;  %v600_v2 = vld [vmem:[#allocation5 + $0x8] sm:$0xff]   ;;  %v179_v47 = vlaneseq }
  0x4b   :  { %579 = vmatprep.subr.bf16.mxu0 %v768_v0  ;;  %583 = vmatprep.mubr.msk.bf16.mxu0 %vm769_vm0, %v768_v0  ;;  %v602_v3 = vld [vmem:[#allocation7 + $0x4] ss:$8 sps:$4 sm:$0xff]   ;;  %v604_v4 = vld [vmem:[#allocation7] ss:$8 sps:$4 sm:$0xff]   ;;  %v605_v6 = vld [vmem:[#allocation7 + $0x14] ss:$8 sps:$4 sm:$0xff]  }
  0x4c   :  { %580 = vmatpush3.bf16.msra.mxu0 %v599_v1  ;;  %v601_v5 = vld [vmem:[#allocation2] sm:$0xff]   ;;  %269 = vmatprep.subr.bf16.mxu1 %v602_v3  ;;  %vm113_vm1 = vcmask 261120   ;;  %v607_v7 = vld [vmem:[#allocation7 + $0x10] ss:$8 sps:$4 sm:$0xff]   ;;  %v611_v10 = vld [vmem:[#allocation7 + $0x34] ss:$8 sps:$4 sm:$0xff]  }
  0x4d   :  { %581 = vmatprep.subr.bf16.mxu0 %v768_v0  ;;  %270 = vmatpush1.bf16.msra.mxu1 %v604_v4  ;;  %v608_v8 = vld [vmem:[#allocation7 + $0x24] ss:$8 sps:$4 sm:$0xff]   ;;  %v610_v9 = vld [vmem:[#allocation7 + $0x20] ss:$8 sps:$4 sm:$0xff]   ;;  %v613_v11 = vld [vmem:[#allocation7 + $0x30] ss:$8 sps:$4 sm:$0xff]  }
  0x4e   :  { %271 = vmatprep.subr.bf16.mxu1 %v605_v6  ;;  %v614_v12 = vld [vmem:[#allocation7 + $0x44] ss:$8 sps:$4 sm:$0xff]   ;;  %v616_v13 = vld [vmem:[#allocation7 + $0x40] ss:$8 sps:$4 sm:$0xff]   ;;  %v617_v14 = vld [vmem:[#allocation7 + $0x54] ss:$8 sps:$4 sm:$0xff]  }
  0x4f   :  { %v619_v15 = vld [vmem:[#allocation7 + $0x50] ss:$8 sps:$4 sm:$0xff]   ;;  %v620_v16 = vld [vmem:[#allocation7 + $0x64] ss:$8 sps:$4 sm:$0xff]   ;;  %v622_v17 = vld [vmem:[#allocation7 + $0x60] ss:$8 sps:$4 sm:$0xff]  }
  0x50   :  { %582 = vmatpush3.bf16.msra.mxu0 %v600_v2  ;;  %v623_v18 = vld [vmem:[#allocation7 + $0x74] ss:$8 sps:$4 sm:$0xff]   ;;  %v625_v19 = vld [vmem:[#allocation7 + $0x70] ss:$8 sps:$4 sm:$0xff]   ;;  %v770_v20 = vmov 0   ;;  %v626_v21 = vld [vmem:[#allocation8 + $0x40] sm:$0xff]  }
  0x51   :  { %272 = vmatpush1.bf16.msra.mxu1 %v607_v7  ;;  %301 = vmatprep.mubr.bf16.mxu1 %v770_v20  ;;  %v627_v22 = vld [vmem:[#allocation8] sm:$0xff]   ;;  %v628_v23 = vld [vmem:[#allocation8 + $0x48] sm:$0xff]   ;;  %v630_v25 = vld [vmem:[#allocation8 + $0x50] sm:$0xff]   ;;  %v180_v48 = vshrl.u32 %v179_v47, 7  ;;  %vm494_vm2 = vcmask 72704   ;;  %s771_s30 = smov [#allocation10]  }
  0x52   :  { %273 = vmatprep.subr.bf16.mxu1 %v608_v8  ;;  %557 = vmatprep.subr.bf16.mxu0 %v626_v21  ;;  %v629_v24 = vld [vmem:[#allocation8 + $0x8] sm:$0xff]   ;;  %v631_v26 = vld [vmem:[#allocation8 + $0x10] sm:$0xff]   ;;  %v632_v27 = vld [vmem:[#allocation8 + $0x58] sm:$0xff]   ;;  %s502_s8 = sshll.u32 %s771_s30, 4  ;;  %s503_s8 = int_to_ptr.vmem [resolvable:$true] %s502_s8 }
  0x53   :  { %584 = vmatmul.mubr.msk.bf16.vlgmr.msra.gmra.mrb[0].mxu0 %vm113_vm1, %v601_v5  ;;  %v633_v28 = vld [vmem:[#allocation8 + $0x18] sm:$0xff]   ;;  %v634_v29 = vld [vmem:[#allocation8 + $0x60] sm:$0xff]   ;;  %v636_v31 = vld [vmem:[#allocation8 + $0x68] sm:$0xff]   ;;  %v181_v49 = vsub.s32 0, %v180_v48  ;;  %v185_v51 = vsub.s32 1, %v180_v48  ;;  %s730_s9 = scalar_lea.vmem %s503_s8, 256  ;;  %p735_p5 = scmp.lt.s32.totalorder %s503_s8, %s503_s8 }
  0x54   :  { %558 = vmatpush3.bf16.msra.mxu0 %v627_v22  ;;  %v635_v30 = vld [vmem:[#allocation8 + $0x20] sm:$0xff]   ;;  %v516_v32 = vld [vmem:[%s905_s2] ss:$0 sm:$0xff]  ;;  %v638_v43 = vld [vmem:[#allocation8 + $0x70] sm:$0xff]   ;;  %p731_p4 = scmp.ne.s32.totalorder %s503_s8, %s730_s9  ;;  %p736_p6 = scmp.lt.s32.totalorder %s730_s9, %s730_s9 }
  0x55   :  { %274 = vmatpush1.bf16.msra.mxu1 %v610_v9  ;;  %559 = vmatprep.subr.bf16.mxu0 %v628_v23  ;;  %v637_v42 = vld [vmem:[#allocation8 + $0x28] sm:$0xff]   ;;  %v639_v44 = vld [vmem:[#allocation8 + $0x30] sm:$0xff]   ;;  %v640_v45 = vld [vmem:[#allocation8 + $0x78] sm:$0xff]  }
  0x56   :  { %275 = vmatprep.subr.bf16.mxu1 %v611_v10  ;;  %v641_v46 = vld [vmem:[#allocation8 + $0x38] sm:$0xff]   ;;  %v177_v50 = vld [vmem:[%s907_s4] sm:$0x3]  ;;  %p737_p7 = por %p736_p6, %p735_p5 }
  0x57   :  { %v182_v52 = vrot.slane %v177_v50, %v181_v49  ;;  %v186_v53 = vrot.slane %v177_v50, %v185_v51  ;;  %v537_v5 = vld [vmem:[%s909_s6] ss:$0 sm:$0xff] }
  0x58   :  { %560 = vmatpush3.bf16.msra.mxu0 %v629_v24  ;;  %p738_p8 = pnand %p737_p7, %p731_p4 }
  0x59   :  { %276 = vmatpush1.bf16.msra.mxu1 %v613_v11  ;;  %561 = vmatprep.subr.bf16.mxu0 %v630_v25 }
  0x5a   :  { %277 = vmatprep.subr.bf16.mxu1 %v614_v12 }
  0x5c   :  { %562 = vmatpush3.bf16.msra.mxu0 %v631_v26 }
  0x5d   :  { %278 = vmatpush1.bf16.msra.mxu1 %v616_v13  ;;  %563 = vmatprep.subr.bf16.mxu0 %v632_v27 }
  0x5e   :  { %279 = vmatprep.subr.bf16.mxu1 %v617_v14 }
  0x60   :  { %564 = vmatpush3.bf16.msra.mxu0 %v633_v28 }
  0x61   :  { %280 = vmatpush1.bf16.msra.mxu1 %v619_v15  ;;  %565 = vmatprep.subr.bf16.mxu0 %v634_v29 }
  0x62   :  { %281 = vmatprep.subr.bf16.mxu1 %v620_v16 }
  0x64   :  { %566 = vmatpush3.bf16.msra.mxu0 %v635_v30 }
  0x65   :  { %282 = vmatpush1.bf16.msra.mxu1 %v622_v17  ;;  %567 = vmatprep.subr.bf16.mxu0 %v636_v31 }
  0x66   :  { %283 = vmatprep.subr.bf16.mxu1 %v623_v18 }
  0x68   :  { %568 = vmatpush3.bf16.msra.mxu0 %v637_v42 }
  0x69   :  { %284 = vmatpush1.bf16.msra.mxu1 %v625_v19  ;;  %569 = vmatprep.subr.bf16.mxu0 %v638_v43 }
  0x6c   :  { %570 = vmatpush3.bf16.msra.mxu0 %v639_v44 }
  0x6d   :  { %571 = vmatprep.subr.bf16.mxu0 %v640_v45 }
  0x70   :  { %572 = vmatpush3.bf16.msra.mxu0 %v641_v46 }
 0x126   :  { %v151_v33 = vpop.f32.mrb[0].mxu0 }
 0x127   :  { %v152_v34 = vadd.f32 %v516_v32, %v151_v33  ;;  %v585_v35 = vpop.f32.mrb[1].mxu0 }
 0x128   :  { %v154_v36 = vpop.f32.mrb[2].mxu0 }
 0x129   :  { %v155_v37 = vadd.f32 %v516_v32, %v154_v36  ;;  %v586_v38 = vpop.f32.mrb[3].mxu0  ;;  %v158_v39 = vmax.f32 %v152_v34, 0.0 }
 0x12b   :  { %v159_v40 = vmax.f32 %v155_v37, 0.0 }
 0x12d   :  { %v160_v41 = vpack.c.bf16 %v159_v40, %v158_v39 }
 0x12f   :  { %302 = vmatmul.mubr.bf16.vlgmr.msra.gmra.mrb[0].mxu1 %v160_v41 }
 0x202   :  { %v303_v54 = vpop.f32.mrb[0].mxu1 }
 0x203   :  { %v304_v55 = vadd.f32 %v303_v54, %v182_v52  ;;  %v305_v56 = vpop.f32.mrb[1].mxu1 }
 0x204   :  { %v306_v57 = vadd.f32 %v305_v56, %v186_v53  ;;  %v307_v58 = vpop.f32.mrb[2].mxu1 }
 0x205   :  { %v308_v59 = vadd.f32 %v307_v58, %v182_v52  ;;  %v309_v60 = vpop.f32.mrb[3].mxu1  ;;  %v312_v62 = vmax.f32 %v304_v55, 0.0 }
 0x206   :  { %v310_v61 = vadd.f32 %v309_v60, %v186_v53  ;;  %v313_v0 = vmax.f32 %v306_v57, 0.0 }
 0x207   :  { %v314_v63 = vmax.f32 %v308_v59, 0.0 }
 0x208   :  { %v315_v1 = vmax.f32 %v310_v61, 0.0 }
 0x209   :  { %v316_v2 = vpack.c.bf16 %v314_v63, %v312_v62 }
 0x20a   :  { %v317_v3 = vpack.c.bf16 %v315_v1, %v313_v0 }
 0x20c   :  { %485 = vmatprep.mubr.bf16.mxu0 %v317_v3 }
 0x20d   :  { %486 = vmatmul.mubr.bf16.vlgmr.msra.gmra.mrb[4].mxu0 %v316_v2 }
 0x2e0   :  { %v573_v4 = vpop.f32.mrb[4].mxu0 }
 0x2e1   :  { %v574_v6 = vpop.f32.mrb[5].mxu0 }
 0x2e2   :  { %v575_v7 = vadd.f32 %v574_v6, %v573_v4  ;;  %v576_v8 = vpop.f32.mrb[6].mxu0 }
 0x2e3   :  { %v577_v9 = vpop.f32.mrb[7].mxu0 }
 0x2e4   :  { %v488_v10 = vadd.f32 %v575_v7, %v537_v5  ;;  %v578_v11 = vadd.f32 %v577_v9, %v576_v8 }
 0x2e6   :  { %v491_v12 = vadd.f32 %v578_v11, %v537_v5  ;;  %495 = vst.msk [vmem:[#allocation10] sm:$0xff] %vm494_vm2, %v488_v10 }
 0x2e8   :  { %496 = vst.msk [vmem:[#allocation10 + $0x8] sm:$0xff] %vm494_vm2, %v491_v12 }
 0x2e9   :  { %741 = shalt.err (!%p738_p8)
}
 0x2ea   :  { %s742_s11 = scalar_lea.hbm %s910_s7, 256 }
 0x2eb   :  { %p743_p9 = scmp.ne.s32.totalorder %s910_s7, %s742_s11  ;;  %p746_p10 = scmp.lt.u32.totalorder %s742_s11, %s910_s7 }
 0x2ed   :  { %p748_p11 = pnand %p746_p10, %p743_p9 }
 0x2ef   :  { %751 = shalt.err (!%p748_p11)
}
 0x2f0   :  { %508 = dma.vmem_to_hbm [thread:$0]  %s503_s8, 256, %s910_s7, [#allocation4], %s765_s0, %s765_s0, %s766_s27  }
 0x2f1   :  { %758 = dma.done.wait [#allocation4], 256  }
 0x2f2   :  { %759 = vsyncadd [#allocation4], 4294967040 }
 0x2f3   :  { %512 = vsyncpa [#allocation3], 1 }
 0x2f4   :  { %513 = vsyncpa [#allocation6], 1 }
 0x2f5   :  { %514 = vsyncpa [#allocation9], 1 }
 0x2f6   :  { %515 = vsyncpa [#allocation4], 1 }

</bundles_post_ra>
